<compile_context>
chip_gen: v7x
topology: tpu7x:2x2x1
jax: 0.10.0
libtpu: 0.0.40
codegen_flags: <defaults>
</compile_context>

<pallas_src>
from functools import partial

import jax
import jax.numpy as jnp
from jax.experimental import pallas as pl
from jax.experimental.pallas import tpu as pltpu


def _round_up(x, m):
    return (x + m - 1) // m * m


def _mish(x):
    # mish(x) = x * tanh(softplus(x)) = x * (e^{2x} + 2 e^x) / (e^{2x} + 2 e^x + 2)
    # Clamp the exp argument: for x > 20, mish(x) == x to fp32 precision and the
    # clamped form already evaluates to x (t / (t + 2) rounds to 1.0).
    xs = jnp.minimum(x, 20.0)
    ex = jnp.exp(xs)
    t = ex * (ex + 2.0)
    return x * t * pl.reciprocal(t + 2.0, approx=True)


def critic_kernel(s_ref, a_ref, w1_ref, w_ref, b_ref, out_ref, *, state_dim):
    s = s_ref[...]
    a = a_ref[...]
    w1 = w1_ref[...]
    b = b_ref[...]

    # Layer 1: x @ W1 == s @ W1[:S] + a @ W1[S:]  (no concat needed).
    h = jnp.dot(s, w1[:state_dim, :], preferred_element_type=jnp.float32)
    h = h + jnp.dot(a, w1[state_dim:, :], preferred_element_type=jnp.float32)
    h = _mish(h + b[0:1, :])
    # Layers 2, 3 (block-diagonal fused q1/q2) and 4 (zero-padded output head).
    h = _mish(jnp.dot(h, w_ref[0], preferred_element_type=jnp.float32) + b[1:2, :])
    h = _mish(jnp.dot(h, w_ref[1], preferred_element_type=jnp.float32) + b[2:3, :])
    out_ref[...] = (
        jnp.dot(h, w_ref[2], preferred_element_type=jnp.float32) + b[3:4, :]
    )


def init_linear(key, in_dim, out_dim):
    # Mimics nn.Linear: weight (out, in), bias (out,), U(-1/sqrt(in), 1/sqrt(in)).
    kw, kb = jax.random.split(key)
    bound = float(in_dim) ** -0.5
    w = jax.random.uniform(kw, (out_dim, in_dim), jnp.float32, -bound, bound)
    b = jax.random.uniform(kb, (out_dim,), jnp.float32, -bound, bound)
    return w, b


def init_critic_params(key, state_dim, action_dim, hidden_dim=64):
    in_dim = state_dim + action_dim
    dims = [(in_dim, hidden_dim), (hidden_dim, hidden_dim),
            (hidden_dim, hidden_dim), (hidden_dim, 1)]
    keys = jax.random.split(key, 8)
    q1 = [init_linear(keys[i], di, do) for i, (di, do) in enumerate(dims)]
    q2 = [init_linear(keys[4 + i], di, do) for i, (di, do) in enumerate(dims)]
    return q1, q2


def pack_critic_params(q1, q2, hidden_dim=64):
    """Pack the 16 per-layer tensors into 3 fused, lane-dense arrays."""
    H = hidden_dim
    (w11, b11), (w12, b12), (w13, b13), (w14, b14) = q1
    (w21, b21), (w22, b22), (w23, b23), (w24, b24) = q2

    # Layer 1: (in, 2H); transposed from PyTorch's (out, in) layout.
    w1 = jnp.concatenate([w11.T, w21.T], axis=1)

    def block_diag(a, b):
        z = jnp.zeros((H, H), jnp.float32)
        top = jnp.concatenate([a, z], axis=1)
        bot = jnp.concatenate([z, b], axis=1)
        return jnp.concatenate([top, bot], axis=0)

    w2 = block_diag(w12.T, w22.T)
    w3 = block_diag(w13.T, w23.T)
    # Layer 4 padded to (2H, 2H): column 0 = q1 head, column 1 = q2 head.
    w4 = jnp.zeros((2 * H, 2 * H), jnp.float32)
    w4 = w4.at[:H, 0].set(w14[0, :]).at[H:, 1].set(w24[0, :])
    w234 = jnp.stack([w2, w3, w4])                     # (3, 2H, 2H)

    b4 = jnp.zeros((2 * H,), jnp.float32).at[0].set(b14[0]).at[1].set(b24[0])
    biases = jnp.stack([
        jnp.concatenate([b11, b21]),
        jnp.concatenate([b12, b22]),
        jnp.concatenate([b13, b23]),
        b4,
    ])                                                 # (4, 2H)
    return w1, w234, biases


def critic_forward(state, action, packed, *, tile_b=512):
    w1, w234, biases = packed
    state = state.astype(jnp.float32)
    action = action.astype(jnp.float32)
    B, S = state.shape
    A = action.shape[1]
    H2 = w1.shape[1]                                   # 2 * hidden_dim

    # Batch tile: multiple of 8 sublanes; pad batch to a whole number of tiles.
    tb = min(tile_b, _round_up(B, 8))
    Bp = _round_up(B, tb)
    if Bp != B:
        state = jnp.pad(state, ((0, Bp - B), (0, 0)))
        action = jnp.pad(action, ((0, Bp - B), (0, 0)))

    out = pl.pallas_call(
        partial(critic_kernel, state_dim=S),
        out_shape=jax.ShapeDtypeStruct((Bp, H2), jnp.float32),
        grid_spec=pltpu.PrefetchScalarGridSpec(
            num_scalar_prefetch=0,
            grid=(Bp // tb,),
            in_specs=[
                pl.BlockSpec((tb, S), lambda i: (i, 0)),
                pl.BlockSpec((tb, A), lambda i: (i, 0)),
                pl.BlockSpec((S + A, H2), lambda i: (0, 0)),     # VMEM-resident
                pl.BlockSpec((3, H2, H2), lambda i: (0, 0, 0)),  # VMEM-resident
                pl.BlockSpec((4, H2), lambda i: (0, 0)),         # VMEM-resident
            ],
            out_specs=pl.BlockSpec((tb, H2), lambda i: (i, 0)),
        ),
        compiler_params=pltpu.CompilerParams(
            dimension_semantics=("parallel",)),
    )(state, action, w1, w234, biases)

    # Column 0 = q1, column 1 = q2 (remaining lanes are zero padding).
    return out[:B, 0:1], out[:B, 1:2]


def critic_forward_ref(state, action, q1_params, q2_params):
    # Pure-JAX reference matching the PyTorch module exactly.
    x = jnp.concatenate([state, action], axis=1).astype(jnp.float32)

    def mish(h):
        return h * jnp.tanh(jax.nn.softplus(h))

    def mlp(layers):
        h = x
        for i, (w, b) in enumerate(layers):
            h = h @ w.T + b
            if i < len(layers) - 1:
                h = mish(h)
        return h

    return mlp(q1_params), mlp(q2_params)


if __name__ == "__main__":
    key = jax.random.PRNGKey(0)
    k_param, k_state, k_action = jax.random.split(key, 3)

    batch, state_dim, action_dim, hidden_dim = 8, 24, 8, 64

    q1_params, q2_params = init_critic_params(k_param, state_dim, action_dim, hidden_dim)
    packed = pack_critic_params(q1_params, q2_params, hidden_dim)

    state = jax.random.normal(k_state, (batch, state_dim), jnp.float32)
    action = jax.random.normal(k_action, (batch, action_dim), jnp.float32)

    q1, q2 = critic_forward(state, action, packed)
    q1, q2 = jax.block_until_ready((q1, q2))

    q1_ref, q2_ref = critic_forward_ref(state, action, q1_params, q2_params)
    assert q1.shape == (batch, 1) and q2.shape == (batch, 1)
    # 5e-3 tolerance: the kernel's Mish uses the EUP approximate reciprocal.
    assert jnp.allclose(q1, q1_ref, atol=5e-3, rtol=5e-3), \
        f"q1 mismatch: {jnp.max(jnp.abs(q1 - q1_ref))}"
    assert jnp.allclose(q2, q2_ref, atol=5e-3, rtol=5e-3), \
        f"q2 mismatch: {jnp.max(jnp.abs(q2 - q2_ref))}"

    print("KERNEL_OK")
</pallas_src>

<mosaic_0001>
module attributes {stable_mosaic.version = 11 : i64} {
  func.func @critic_kernel(%arg0: i32, %arg1: memref<8x24xf32, #tpu.memory_space<vmem>>, %arg2: memref<8x8xf32, #tpu.memory_space<vmem>>, %arg3: memref<32x128xf32, #tpu.memory_space<vmem>>, %arg4: memref<3x128x128xf32, #tpu.memory_space<vmem>>, %arg5: memref<4x128xf32, #tpu.memory_space<vmem>>, %arg6: memref<8x128xf32, #tpu.memory_space<vmem>>) attributes {dimension_semantics = [#tpu.dimension_semantics<parallel>], iteration_bounds = array<i64: 1>, scalar_prefetch = 0 : i64, scratch_operands = 0 : i64, tpu.core_type = #tpu.core_type<tc>, window_params = [{transform_indices = @transform_0, window_bounds = array<i64: 8, 24>}, {transform_indices = @transform_1, window_bounds = array<i64: 8, 8>}, {pipeline_mode = #tpu.pipeline_mode<synchronous>, transform_indices = @transform_2, window_bounds = array<i64: 32, 128>}, {pipeline_mode = #tpu.pipeline_mode<synchronous>, transform_indices = @transform_3, window_bounds = array<i64: 3, 128, 128>}, {pipeline_mode = #tpu.pipeline_mode<synchronous>, transform_indices = @transform_4, window_bounds = array<i64: 4, 128>}, {transform_indices = @transform_5, window_bounds = array<i64: 8, 128>}]} {
    %c0 = arith.constant 0 : index
    %c0_0 = arith.constant 0 : index
    %0 = vector.load %arg1[%c0, %c0_0] : memref<8x24xf32, #tpu.memory_space<vmem>>, vector<8x24xf32>
    %c0_1 = arith.constant 0 : index
    %c0_2 = arith.constant 0 : index
    %1 = vector.load %arg2[%c0_1, %c0_2] : memref<8x8xf32, #tpu.memory_space<vmem>>, vector<8x8xf32>
    %c0_3 = arith.constant 0 : index
    %c0_4 = arith.constant 0 : index
    %2 = vector.load %arg3[%c0_3, %c0_4] : memref<32x128xf32, #tpu.memory_space<vmem>>, vector<32x128xf32>
    %c0_5 = arith.constant 0 : index
    %c0_6 = arith.constant 0 : index
    %3 = vector.load %arg5[%c0_5, %c0_6] : memref<4x128xf32, #tpu.memory_space<vmem>>, vector<4x128xf32>
    %4 = vector.extract_strided_slice %2 {offsets = [0, 0], sizes = [24, 128], strides = [1, 1]} : vector<32x128xf32> to vector<24x128xf32>
    %cst = arith.constant dense<0.000000e+00> : vector<8x128xf32>
    %5 = tpu.matmul %0, %4, %cst {dimension_numbers = #tpu.dot_dimension_numbers<[1], [0], [0], [1], [0, 0, 1, 1], [], []>} : vector<8x24xf32>, vector<24x128xf32>, vector<8x128xf32> -> vector<8x128xf32>
    %6 = vector.extract_strided_slice %2 {offsets = [24, 0], sizes = [8, 128], strides = [1, 1]} : vector<32x128xf32> to vector<8x128xf32>
    %cst_7 = arith.constant dense<0.000000e+00> : vector<8x128xf32>
    %7 = tpu.matmul %1, %6, %cst_7 {dimension_numbers = #tpu.dot_dimension_numbers<[1], [0], [0], [1], [0, 0, 1, 1], [], []>} : vector<8x8xf32>, vector<8x128xf32>, vector<8x128xf32> -> vector<8x128xf32>
    %8 = arith.addf %5, %7 : vector<8x128xf32>
    %9 = vector.extract_strided_slice %3 {offsets = [0, 0], sizes = [1, 128], strides = [1, 1]} : vector<4x128xf32> to vector<1x128xf32>
    %10 = vector.broadcast %9 : vector<1x128xf32> to vector<8x128xf32>
    %11 = arith.addf %8, %10 : vector<8x128xf32>
    %cst_8 = arith.constant 2.000000e+01 : f32
    %12 = vector.broadcast %cst_8 : f32 to vector<8x128xf32>
    %13 = arith.minimumf %11, %12 : vector<8x128xf32>
    %14 = math.exp %13 : vector<8x128xf32>
    %cst_9 = arith.constant 2.000000e+00 : f32
    %15 = vector.broadcast %cst_9 : f32 to vector<8x128xf32>
    %16 = arith.addf %14, %15 : vector<8x128xf32>
    %17 = arith.mulf %14, %16 : vector<8x128xf32>
    %18 = arith.mulf %11, %17 : vector<8x128xf32>
    %cst_10 = arith.constant 2.000000e+00 : f32
    %19 = vector.broadcast %cst_10 : f32 to vector<8x128xf32>
    %20 = arith.addf %17, %19 : vector<8x128xf32>
    %21 = tpu.reciprocal %20 {approx = true} : vector<8x128xf32> -> vector<8x128xf32>
    %22 = arith.mulf %18, %21 : vector<8x128xf32>
    %c0_11 = arith.constant 0 : index
    %c0_12 = arith.constant 0 : index
    %c0_13 = arith.constant 0 : index
    %23 = vector.load %arg4[%c0_11, %c0_12, %c0_13] : memref<3x128x128xf32, #tpu.memory_space<vmem>>, vector<1x128x128xf32>
    %24 = vector.shape_cast %23 : vector<1x128x128xf32> to vector<128x128xf32>
    %cst_14 = arith.constant dense<0.000000e+00> : vector<8x128xf32>
    %25 = tpu.matmul %22, %24, %cst_14 {dimension_numbers = #tpu.dot_dimension_numbers<[1], [0], [0], [1], [0, 0, 1, 1], [], []>} : vector<8x128xf32>, vector<128x128xf32>, vector<8x128xf32> -> vector<8x128xf32>
    %26 = vector.extract_strided_slice %3 {offsets = [1, 0], sizes = [1, 128], strides = [1, 1]} : vector<4x128xf32> to vector<1x128xf32>
    %27 = vector.broadcast %26 : vector<1x128xf32> to vector<8x128xf32>
    %28 = arith.addf %25, %27 : vector<8x128xf32>
    %cst_15 = arith.constant 2.000000e+01 : f32
    %29 = vector.broadcast %cst_15 : f32 to vector<8x128xf32>
    %30 = arith.minimumf %28, %29 : vector<8x128xf32>
    %31 = math.exp %30 : vector<8x128xf32>
    %cst_16 = arith.constant 2.000000e+00 : f32
    %32 = vector.broadcast %cst_16 : f32 to vector<8x128xf32>
    %33 = arith.addf %31, %32 : vector<8x128xf32>
    %34 = arith.mulf %31, %33 : vector<8x128xf32>
    %35 = arith.mulf %28, %34 : vector<8x128xf32>
    %cst_17 = arith.constant 2.000000e+00 : f32
    %36 = vector.broadcast %cst_17 : f32 to vector<8x128xf32>
    %37 = arith.addf %34, %36 : vector<8x128xf32>
    %38 = tpu.reciprocal %37 {approx = true} : vector<8x128xf32> -> vector<8x128xf32>
    %39 = arith.mulf %35, %38 : vector<8x128xf32>
    %c1 = arith.constant 1 : index
    %c0_18 = arith.constant 0 : index
    %c0_19 = arith.constant 0 : index
    %40 = vector.load %arg4[%c1, %c0_18, %c0_19] : memref<3x128x128xf32, #tpu.memory_space<vmem>>, vector<1x128x128xf32>
    %41 = vector.shape_cast %40 : vector<1x128x128xf32> to vector<128x128xf32>
    %cst_20 = arith.constant dense<0.000000e+00> : vector<8x128xf32>
    %42 = tpu.matmul %39, %41, %cst_20 {dimension_numbers = #tpu.dot_dimension_numbers<[1], [0], [0], [1], [0, 0, 1, 1], [], []>} : vector<8x128xf32>, vector<128x128xf32>, vector<8x128xf32> -> vector<8x128xf32>
    %43 = vector.extract_strided_slice %3 {offsets = [2, 0], sizes = [1, 128], strides = [1, 1]} : vector<4x128xf32> to vector<1x128xf32>
    %44 = vector.broadcast %43 : vector<1x128xf32> to vector<8x128xf32>
    %45 = arith.addf %42, %44 : vector<8x128xf32>
    %cst_21 = arith.constant 2.000000e+01 : f32
    %46 = vector.broadcast %cst_21 : f32 to vector<8x128xf32>
    %47 = arith.minimumf %45, %46 : vector<8x128xf32>
    %48 = math.exp %47 : vector<8x128xf32>
    %cst_22 = arith.constant 2.000000e+00 : f32
    %49 = vector.broadcast %cst_22 : f32 to vector<8x128xf32>
    %50 = arith.addf %48, %49 : vector<8x128xf32>
    %51 = arith.mulf %48, %50 : vector<8x128xf32>
    %52 = arith.mulf %45, %51 : vector<8x128xf32>
    %cst_23 = arith.constant 2.000000e+00 : f32
    %53 = vector.broadcast %cst_23 : f32 to vector<8x128xf32>
    %54 = arith.addf %51, %53 : vector<8x128xf32>
    %55 = tpu.reciprocal %54 {approx = true} : vector<8x128xf32> -> vector<8x128xf32>
    %56 = arith.mulf %52, %55 : vector<8x128xf32>
    %c2 = arith.constant 2 : index
    %c0_24 = arith.constant 0 : index
    %c0_25 = arith.constant 0 : index
    %57 = vector.load %arg4[%c2, %c0_24, %c0_25] : memref<3x128x128xf32, #tpu.memory_space<vmem>>, vector<1x128x128xf32>
    %58 = vector.shape_cast %57 : vector<1x128x128xf32> to vector<128x128xf32>
    %cst_26 = arith.constant dense<0.000000e+00> : vector<8x128xf32>
    %59 = tpu.matmul %56, %58, %cst_26 {dimension_numbers = #tpu.dot_dimension_numbers<[1], [0], [0], [1], [0, 0, 1, 1], [], []>} : vector<8x128xf32>, vector<128x128xf32>, vector<8x128xf32> -> vector<8x128xf32>
    %60 = vector.extract_strided_slice %3 {offsets = [3, 0], sizes = [1, 128], strides = [1, 1]} : vector<4x128xf32> to vector<1x128xf32>
    %61 = vector.broadcast %60 : vector<1x128xf32> to vector<8x128xf32>
    %62 = arith.addf %59, %61 : vector<8x128xf32>
    %c0_27 = arith.constant 0 : index
    %c0_28 = arith.constant 0 : index
    %63 = vector.load %arg6[%c0_27, %c0_28] : memref<8x128xf32, #tpu.memory_space<vmem>>, vector<8x128xf32>
    tpu.vector_store %arg6[%c0_27, %c0_28], %62 {strides = array<i32>} : memref<8x128xf32, #tpu.memory_space<vmem>>, vector<8x128xf32>,
    return
  }
  func.func @transform_0(%arg0: i32) -> (i32, i32) {
    %c0_i32 = arith.constant 0 : i32
    %c0_i32_0 = arith.constant 0 : i32
    return %arg0, %c0_i32 : i32, i32
  }
  func.func @transform_1(%arg0: i32) -> (i32, i32) {
    %c0_i32 = arith.constant 0 : i32
    %c0_i32_0 = arith.constant 0 : i32
    return %arg0, %c0_i32 : i32, i32
  }
  func.func @transform_2(%arg0: i32) -> (i32, i32) {
    %c0_i32 = arith.constant 0 : i32
    %c0_i32_0 = arith.constant 0 : i32
    %c0_i32_1 = arith.constant 0 : i32
    return %c0_i32, %c0_i32_0 : i32, i32
  }
  func.func @transform_3(%arg0: i32) -> (i32, i32, i32) {
    %c0_i32 = arith.constant 0 : i32
    %c0_i32_0 = arith.constant 0 : i32
    %c0_i32_1 = arith.constant 0 : i32
    %c0_i32_2 = arith.constant 0 : i32
    return %c0_i32, %c0_i32_0, %c0_i32_1 : i32, i32, i32
  }
  func.func @transform_4(%arg0: i32) -> (i32, i32) {
    %c0_i32 = arith.constant 0 : i32
    %c0_i32_0 = arith.constant 0 : i32
    %c0_i32_1 = arith.constant 0 : i32
    return %c0_i32, %c0_i32_0 : i32, i32
  }
  func.func @transform_5(%arg0: i32) -> (i32, i32) {
    %c0_i32 = arith.constant 0 : i32
    %c0_i32_0 = arith.constant 0 : i32
    return %arg0, %c0_i32 : i32, i32
  }
}

</mosaic_0001>

<bundles_post_ra>
// kernel: tpu_custom_call.1
= control target key start
LH: loop header
LB: loop body
LE: loop exit
PB: predicated region body
PF: predicated region fallthrough
CT: control target
= control target key end

     0   :  { %10 = vsyncpa [#allocation3], 0  ;;  %s1094_s0 = inlined_call_operand.hbm [shape: f32[8,24], index: 0, kind: input, shape index: {}]   ;;  %s1095_s1 = inlined_call_operand.hbm [shape: f32[8,8], index: 1, kind: input, shape index: {}]   ;;  %s1096_s2 = inlined_call_operand.hbm [shape: f32[32,128], index: 2, kind: input, shape index: {}]   ;;  %s1097_s3 = inlined_call_operand.hbm [shape: f32[3,128,128], index: 3, kind: input, shape index: {}]   ;;  %s1098_s4 = inlined_call_operand.vmem [shape: f32[4,128], index: 4, kind: input, shape index: {}]   ;;  %s1099_s5 = inlined_call_operand.hbm [shape: f32[8,128], index: 5, kind: output, shape index: {}]  }
   0x1   :  { %11 = vsyncpa [#allocation6], 0 }
   0x2   :  { %12 = vsyncpa [#allocation9], 0 }
   0x3   :  { %13 = vsyncpa [#allocation4], 0  ;;  %s942_s18 = smov [#allocation5]   ;;  %s943_s20 = smov [#allocation2]  }
   0x4   :  { %s30_s19 = sshll.u32 %s942_s18, 4  ;;  %s20_s21 = sshll.u32 %s943_s20, 4  ;;  %s31_s19 = int_to_ptr.vmem [resolvable:$true] %s30_s19  ;;  %s21_s21 = int_to_ptr.vmem [resolvable:$true] %s20_s21 }
   0x5   :  { %s824_s24 = scalar_lea.hbm %s1095_s1, 128 }
   0x6   :  { %p825_p0 = scmp.ne.s32.totalorder %s1095_s1, %s824_s24  ;;  %p828_p1 = scmp.lt.u32.totalorder %s824_s24, %s1095_s1 }
   0x8   :  { %p830_p2 = pnand %p828_p1, %p825_p0 }
   0xa   :  { %833 = shalt.err (!%p830_p2)
}
   0xb   :  { %s834_s29 = scalar_lea.vmem %s31_s19, 128  ;;  %p839_p4 = scmp.lt.s32.totalorder %s31_s19, %s31_s19 }
   0xc   :  { %p835_p3 = scmp.ne.s32.totalorder %s31_s19, %s834_s29  ;;  %p840_p5 = scmp.lt.s32.totalorder %s834_s29, %s834_s29 }
   0xe   :  { %p841_p6 = por %p840_p5, %p839_p4 }
  0x10   :  { %p842_p7 = pnand %p841_p6, %p835_p3 }
  0x12   :  { %845 = shalt.err (!%p842_p7)
}
  0x13   :  { %33 = dma.hbm_to_vmem [thread:$0]  %s1095_s1, 128, %s31_s19, [#allocation6]  }
  0x14   :  { %s846_s9 = scalar_lea.hbm %s1094_s0, 128 }
  0x15   :  { %p847_p8 = scmp.ne.s32.totalorder %s1094_s0, %s846_s9  ;;  %p850_p9 = scmp.lt.u32.totalorder %s846_s9, %s1094_s0 }
  0x17   :  { %p852_p10 = pnand %p850_p9, %p847_p8 }
  0x19   :  { %855 = shalt.err (!%p852_p10)
}
  0x1a   :  { %s856_s14 = scalar_lea.vmem %s21_s21, 128  ;;  %p861_p12 = scmp.lt.s32.totalorder %s21_s21, %s21_s21 }
  0x1b   :  { %p857_p11 = scmp.ne.s32.totalorder %s21_s21, %s856_s14  ;;  %p862_p13 = scmp.lt.s32.totalorder %s856_s14, %s856_s14 }
  0x1d   :  { %p863_p0 = por %p862_p13, %p861_p12 }
  0x1f   :  { %p864_p1 = pnand %p863_p0, %p857_p11 }
  0x21   :  { %867 = shalt.err (!%p864_p1)
}
  0x22   :  { %23 = dma.hbm_to_vmem [thread:$0]  %s1094_s0, 128, %s21_s21, [#allocation3]  }
  0x23   :  { %s944_s16 = smov [#allocation7]   ;;  %s868_s20 = scalar_lea.hbm %s1096_s2, 512 }
  0x24   :  { %s39_s17 = sshll.u32 %s944_s16, 4  ;;  %p869_p2 = scmp.ne.s32.totalorder %s1096_s2, %s868_s20  ;;  %s40_s17 = int_to_ptr.vmem [resolvable:$true] %s39_s17 }
  0x25   :  { %p872_p3 = scmp.lt.u32.totalorder %s868_s20, %s1096_s2 }
  0x27   :  { %p874_p4 = pnand %p872_p3, %p869_p2 }
  0x29   :  { %877 = shalt.err (!%p874_p4)
}
  0x2a   :  { %s878_s26 = scalar_lea.vmem %s40_s17, 512  ;;  %p883_p6 = scmp.lt.s32.totalorder %s40_s17, %s40_s17 }
  0x2b   :  { %p879_p5 = scmp.ne.s32.totalorder %s40_s17, %s878_s26  ;;  %p884_p7 = scmp.lt.s32.totalorder %s878_s26, %s878_s26 }
  0x2d   :  { %p885_p8 = por %p884_p7, %p883_p6 }
  0x2f   :  { %p886_p9 = pnand %p885_p8, %p879_p5 }
  0x31   :  { %889 = shalt.err (!%p886_p9)
}
  0x32   :  { %s945_s0 = smov 128   ;;  %s946_s21 = smov 8  }
  0x33   :  { %45 = dma.hbm_to_vmem [thread:$0]  %s1096_s2, 512, %s40_s17, [#allocation6], %s945_s0, %s945_s0, %s946_s21  }
  0x34   :  { %s947_s29 = smov [#allocation8]   ;;  %s890_s8 = scalar_lea.hbm %s1097_s3, 6144 }
  0x35   :  { %s51_s30 = sshll.u32 %s947_s29, 4  ;;  %p891_p10 = scmp.ne.s32.totalorder %s1097_s3, %s890_s8  ;;  %s52_s30 = int_to_ptr.vmem [resolvable:$true] %s51_s30 }
  0x36   :  { %p894_p11 = scmp.lt.u32.totalorder %s890_s8, %s1097_s3 }
  0x38   :  { %p896_p12 = pnand %p894_p11, %p891_p10 }
  0x3a   :  { %899 = shalt.err (!%p896_p12)
}
  0x3b   :  { %s900_s13 = scalar_lea.vmem %s52_s30, 6144  ;;  %p905_p0 = scmp.lt.s32.totalorder %s52_s30, %s52_s30 }
  0x3c   :  { %p901_p13 = scmp.ne.s32.totalorder %s52_s30, %s900_s13  ;;  %p906_p1 = scmp.lt.s32.totalorder %s900_s13, %s900_s13 }
  0x3e   :  { %p907_p2 = por %p906_p1, %p905_p0 }
  0x40   :  { %p908_p3 = pnand %p907_p2, %p901_p13 }
  0x42   :  { %911 = shalt.err (!%p908_p3)
}
  0x43   :  { %57 = dma.hbm_to_vmem [thread:$0]  %s1097_s3, 6144, %s52_s30, [#allocation9], %s945_s0, %s945_s0, %s946_s21  }
  0x44   :  { %934 = dma.done.wait [#allocation3], 128  }
  0x45   :  { %935 = vsyncadd [#allocation3], 4294967168 }
  0x46   :  { %936 = dma.done.wait [#allocation6], 640  }
  0x47   :  { %937 = vsyncadd [#allocation6], 4294966656 }
  0x48   :  { %938 = dma.done.wait [#allocation9], 6144  }
  0x49   :  { %939 = vsyncadd [#allocation9], 4294961152  ;;  %v948_v0 = vmov 0.0   ;;  %vm949_vm0 = vmmov 0   ;;  %v950_v1 = vmov 0.0|0.0   ;;  %vm79_vm1 = vcmask 64512  }
  0x4a   :  { %608 = vmatprep.subr.mxu1 %v948_v0  ;;  %610 = vmatprep.mubr.msk.f32.mxu1 %vm949_vm0, %v948_v0  ;;  %v77_v2 = vld [vmem:[#allocation7 + $0x18] sm:$0xff]  ;;  %v74_v4 = vld [vmem:[#allocation7] sm:$0xff]  ;;  %v75_v5 = vld [vmem:[#allocation7 + $0x8] sm:$0xff]  ;;  %vm153_vm2 = vcmask 195584   ;;  %v227_v33 = vlaneseq }
  0x4b   :  { %730 = vmatprep.subr.bf16.mxu0 %v950_v1  ;;  %654 = vmatprep.mubr.msk.f32.mxu0 %vm949_vm0, %v948_v0  ;;  %v73_v3 = vld [vmem:[#allocation5] sm:$0xff]  ;;  %v728_v6 = vpack.c.bf16 %v75_v5, %v74_v4  ;;  %v76_v7 = vld [vmem:[#allocation7 + $0x10] sm:$0xff]  ;;  %v241_v9 = vld [vmem:[#allocation8] sm:$0xff] }
  0x4c   :  { %609 = vmatpush3.msra.mxu1 %v77_v2  ;;  %v72_v8 = vld [vmem:[#allocation2] sm:$0xff]  ;;  %v242_v10 = vld [vmem:[#allocation8 + $0x8] sm:$0xff]  ;;  %v244_v13 = vld [vmem:[#allocation8 + $0x18] sm:$0xff]  ;;  %v1051_v34 = vshrl.u32 %v227_v33, 7 }
  0x4d   :  { %611 = vmatmul.mubr.msk.f32.vlgmr.msra.gmra.mrb[0].mxu1 %vm79_vm1, %v73_v3  ;;  %727 = vmatprep.subr.bf16.mxu1 %v950_v1  ;;  %v731_v11 = vpack.c.bf16 %v242_v10, %v241_v9  ;;  %v243_v12 = vld [vmem:[#allocation8 + $0x10] sm:$0xff]  ;;  %v245_v15 = vld [vmem:[#allocation8 + $0x20] sm:$0xff]  ;;  %v246_v16 = vld [vmem:[#allocation8 + $0x28] sm:$0xff] }
  0x4e   :  { %619 = vmatprep.mubr.msk.f32.mxu1 %vm949_vm0, %v948_v0  ;;  %729 = vmatpush3.bf16.msra.mxu1 %v728_v6  ;;  %v734_v14 = vpack.c.bf16 %v244_v13, %v243_v12  ;;  %v737_v17 = vpack.c.bf16 %v246_v16, %v245_v15  ;;  %v247_v18 = vld [vmem:[#allocation8 + $0x30] sm:$0xff]  ;;  %v248_v19 = vld [vmem:[#allocation8 + $0x38] sm:$0xff]  ;;  %v249_v21 = vld [vmem:[#allocation8 + $0x40] sm:$0xff]  ;;  %v229_v37 = vsub.s32 0, %v1051_v34 }
  0x4f   :  { %617 = vmatprep.subr.mxu1 %v948_v0  ;;  %732 = vmatpush3.bf16.msra.mxu0 %v731_v11  ;;  %v740_v20 = vpack.c.bf16 %v248_v19, %v247_v18  ;;  %v250_v22 = vld [vmem:[#allocation8 + $0x48] sm:$0xff]  ;;  %v251_v24 = vld [vmem:[#allocation8 + $0x50] sm:$0xff]  ;;  %v252_v25 = vld [vmem:[#allocation8 + $0x58] sm:$0xff] }
  0x50   :  { %733 = vmatprep.subr.bf16.mxu0 %v950_v1  ;;  %v743_v23 = vpack.c.bf16 %v250_v22, %v249_v21  ;;  %v746_v26 = vpack.c.bf16 %v252_v25, %v251_v24  ;;  %v253_v27 = vld [vmem:[#allocation8 + $0x60] sm:$0xff]  ;;  %v254_v28 = vld [vmem:[#allocation8 + $0x68] sm:$0xff]  ;;  %v255_v30 = vld [vmem:[#allocation8 + $0x70] sm:$0xff] }
  0x51   :  { %v749_v29 = vpack.c.bf16 %v254_v28, %v253_v27  ;;  %v256_v31 = vld [vmem:[#allocation8 + $0x78] sm:$0xff]  ;;  %v1057_v38 = vld [vmem:[%s1098_s4] sm:$0xf]  ;;  %v341_v53 = vld [vmem:[#allocation8 + $0x80] sm:$0xff]  ;;  %s951_s4 = smov [#allocation10]  }
  0x52   :  { %618 = vmatpush3.msra.mxu1 %v76_v7  ;;  %v752_v32 = vpack.c.bf16 %v256_v31, %v255_v30  ;;  %v230_v39 = vrot.slane %v1057_v38, %v229_v37  ;;  %v342_v54 = vld [vmem:[#allocation8 + $0x88] sm:$0xff]  ;;  %v343_v56 = vld [vmem:[#allocation8 + $0x90] sm:$0xff]  ;;  %v344_v57 = vld [vmem:[#allocation8 + $0x98] sm:$0xff]  ;;  %s538_s15 = sshll.u32 %s951_s4, 4  ;;  %s539_s15 = int_to_ptr.vmem [resolvable:$true] %s538_s15 }
  0x53   :  { %620 = vmatmul.mubr.msk.f32.vlgmr.msra.gmra.mrb[2].mxu1 %vm153_vm2, %v72_v8  ;;  %754 = vmatprep.subr.bf16.mxu1 %v950_v1  ;;  %v755_v55 = vpack.c.bf16 %v342_v54, %v341_v53  ;;  %v758_v58 = vpack.c.bf16 %v344_v57, %v343_v56  ;;  %v345_v59 = vld [vmem:[#allocation8 + $0xa0] sm:$0xff]  ;;  %v346_v60 = vld [vmem:[#allocation8 + $0xa8] sm:$0xff]  ;;  %v347_v62 = vld [vmem:[#allocation8 + $0xb0] sm:$0xff]  ;;  %v359_v54 = vsub.s32 2, %v1051_v34  ;;  %s912_s16 = scalar_lea.vmem %s539_s15, 128  ;;  %p917_p5 = scmp.lt.s32.totalorder %s539_s15, %s539_s15 }
  0x54   :  { %689 = vmatprep.mubr.msk.f32.mxu1 %vm949_vm0, %v948_v0  ;;  %735 = vmatpush3.bf16.msra.mxu0 %v734_v14  ;;  %v761_v61 = vpack.c.bf16 %v346_v60, %v345_v59  ;;  %v348_v63 = vld [vmem:[#allocation8 + $0xb8] sm:$0xff]  ;;  %v349_v2 = vld [vmem:[#allocation8 + $0xc0] sm:$0xff]  ;;  %v350_v3 = vld [vmem:[#allocation8 + $0xc8] sm:$0xff]  ;;  %v259_v14 = vsub.s32 1, %v1051_v34  ;;  %p913_p4 = scmp.ne.s32.totalorder %s539_s15, %s912_s16  ;;  %p918_p6 = scmp.lt.s32.totalorder %s912_s16, %s912_s16 }
  0x55   :  { %736 = vmatprep.subr.bf16.mxu0 %v950_v1  ;;  %756 = vmatpush3.bf16.msra.mxu1 %v755_v55  ;;  %v767_v4 = vpack.c.bf16 %v350_v3, %v349_v2  ;;  %v351_v5 = vld [vmem:[#allocation8 + $0xd0] sm:$0xff]  ;;  %v352_v6 = vld [vmem:[#allocation8 + $0xd8] sm:$0xff]  ;;  %v353_v8 = vld [vmem:[#allocation8 + $0xe0] sm:$0xff]  ;;  %v360_v55 = vrot.slane %v1057_v38, %v359_v54 }
  0x56   :  { %757 = vmatprep.subr.bf16.mxu1 %v950_v1  ;;  %v770_v7 = vpack.c.bf16 %v352_v6, %v351_v5  ;;  %v354_v9 = vld [vmem:[#allocation8 + $0xe8] sm:$0xff]  ;;  %v355_v11 = vld [vmem:[#allocation8 + $0xf0] sm:$0xff]  ;;  %v356_v12 = vld [vmem:[#allocation8 + $0xf8] sm:$0xff]  ;;  %v260_v15 = vrot.slane %v1057_v38, %v259_v14  ;;  %p919_p7 = por %p918_p6, %p917_p5 }
  0x57   :  { %v773_v10 = vpack.c.bf16 %v354_v9, %v353_v8  ;;  %v776_v13 = vpack.c.bf16 %v356_v12, %v355_v11  ;;  %v441_v28 = vld [vmem:[#allocation8 + $0x100] sm:$0xff]  ;;  %v443_v31 = vld [vmem:[#allocation8 + $0x110] sm:$0xff] }
  0x58   :  { %738 = vmatpush3.bf16.msra.mxu0 %v737_v17  ;;  %p920_p8 = pnand %p919_p7, %p913_p4 }
  0x59   :  { %739 = vmatprep.subr.bf16.mxu0 %v950_v1  ;;  %759 = vmatpush3.bf16.msra.mxu1 %v758_v58 }
  0x5a   :  { %760 = vmatprep.subr.bf16.mxu1 %v950_v1 }
  0x5c   :  { %741 = vmatpush3.bf16.msra.mxu0 %v740_v20 }
  0x5d   :  { %742 = vmatprep.subr.bf16.mxu0 %v950_v1  ;;  %762 = vmatpush3.bf16.msra.mxu1 %v761_v61 }
  0x5e   :  { %763 = vmatprep.subr.bf16.mxu1 %v950_v1 }
  0x60   :  { %744 = vmatpush3.bf16.msra.mxu0 %v743_v23 }
  0x61   :  { %745 = vmatprep.subr.bf16.mxu0 %v950_v1 }
  0x64   :  { %747 = vmatpush3.bf16.msra.mxu0 %v746_v26 }
  0x65   :  { %748 = vmatprep.subr.bf16.mxu0 %v950_v1 }
  0x68   :  { %750 = vmatpush3.bf16.msra.mxu0 %v749_v29  ;;  %v442_v29 = vld [vmem:[#allocation8 + $0x108] sm:$0xff] }
  0x69   :  { %751 = vmatprep.subr.bf16.mxu0 %v950_v1  ;;  %v779_v30 = vpack.c.bf16 %v442_v29, %v441_v28 }
  0x6c   :  { %753 = vmatpush3.bf16.msra.mxu0 %v752_v32  ;;  %v444_v32 = vld [vmem:[#allocation8 + $0x118] sm:$0xff] }
  0x6d   :  { %778 = vmatprep.subr.bf16.mxu0 %v950_v1  ;;  %v782_v33 = vpack.c.bf16 %v444_v32, %v443_v31 }
 0x120   :  { %v149_v35 = vpop.f32.mrb[0].mxu1 }
 0x121   :  { %v612_v36 = vpop.f32.mrb[1].mxu1 }
 0x122   :  { %v446_v36 = vld [vmem:[#allocation8 + $0x128] sm:$0xff] }
 0x126   :  { %v223_v40 = vpop.f32.mrb[2].mxu1 }
 0x127   :  { %v224_v41 = vadd.f32 %v223_v40, %v149_v35  ;;  %v621_v42 = vpop.f32.mrb[3].mxu1  ;;  %v445_v35 = vld [vmem:[#allocation8 + $0x120] sm:$0xff]  ;;  %v448_v40 = vld [vmem:[#allocation8 + $0x138] sm:$0xff] }
 0x128   :  { %v785_v37 = vpack.c.bf16 %v446_v36, %v445_v35  ;;  %v449_v42 = vld [vmem:[#allocation8 + $0x140] sm:$0xff] }
 0x129   :  { %v231_v43 = vadd.f32 %v230_v39, %v224_v41  ;;  %v447_v39 = vld [vmem:[#allocation8 + $0x130] sm:$0xff] }
 0x12a   :  { %v788_v41 = vpack.c.bf16 %v448_v40, %v447_v39 }
 0x12b   :  { %v232_v44 = vmin.f32 %v231_v43, 20.0 }
 0x12d   :  { %v233_v45 = vmul.f32 1.442695, %v232_v44 }
 0x12f   :  { %812 = vpow2.f32 %v233_v45  ;;  %v451_v45 = vld [vmem:[#allocation8 + $0x150] sm:$0xff] }
 0x139   :  { %v813_v46 = vpop.eup %812 }
 0x13a   :  { %v235_v47 = vadd.f32 2.0, %v813_v46 }
 0x13c   :  { %v236_v48 = vmul.f32 %v813_v46, %v235_v47  ;;  %v452_v46 = vld [vmem:[#allocation8 + $0x158] sm:$0xff] }
 0x13d   :  { %v794_v47 = vpack.c.bf16 %v452_v46, %v451_v45 }
 0x13e   :  { %v238_v49 = vadd.f32 2.0, %v236_v48  ;;  %v237_v50 = vmul.f32 %v236_v48, %v231_v43  ;;  %v450_v43 = vld [vmem:[#allocation8 + $0x148] sm:$0xff]  ;;  %v453_v48 = vld [vmem:[#allocation8 + $0x160] sm:$0xff] }
 0x13f   :  { %v791_v44 = vpack.c.bf16 %v450_v43, %v449_v42 }
 0x140   :  { %814 = vrcp.f32 %v238_v49  ;;  %v454_v49 = vld [vmem:[#allocation8 + $0x168] sm:$0xff] }
 0x14a   :  { %v815_v51 = vpop.eup %814 }
 0x14b   :  { %v240_v52 = vmul.f32 %v815_v51, %v237_v50  ;;  %v797_v50 = vpack.c.bf16 %v454_v49, %v453_v48  ;;  %v455_v51 = vld [vmem:[#allocation8 + $0x170] sm:$0xff] }
 0x14d   :  { %655 = vmatmul.mubr.f32.vlgmr.msra.gmra.mrb[0].mxu0 %v240_v52  ;;  %v456_v52 = vld [vmem:[#allocation8 + $0x178] sm:$0xff] }
 0x14e   :  { %724 = vmatprep.mubr.msk.f32.mxu0 %vm949_vm0, %v948_v0  ;;  %v764_v0 = vpack.c.bf16 %v348_v63, %v347_v62  ;;  %780 = vmatpush3.bf16.msra.mxu0 %v779_v30  ;;  %v800_v53 = vpack.c.bf16 %v456_v52, %v455_v51 }
 0x14f   :  { %781 = vmatprep.subr.bf16.mxu0 %v950_v1 }
 0x150   :  { %765 = vmatpush3.bf16.msra.mxu1 %v764_v0 }
 0x151   :  { %766 = vmatprep.subr.bf16.mxu1 %v950_v1 }
 0x152   :  { %783 = vmatpush3.bf16.msra.mxu0 %v782_v33 }
 0x153   :  { %784 = vmatprep.subr.bf16.mxu0 %v950_v1 }
 0x154   :  { %768 = vmatpush3.bf16.msra.mxu1 %v767_v4  ;;  %v459_v4 = vsub.s32 3, %v1051_v34 }
 0x155   :  { %769 = vmatprep.subr.bf16.mxu1 %v950_v1 }
 0x156   :  { %786 = vmatpush3.bf16.msra.mxu0 %v785_v37  ;;  %v460_v5 = vrot.slane %v1057_v38, %v459_v4 }
 0x157   :  { %787 = vmatprep.subr.bf16.mxu0 %v950_v1 }
 0x158   :  { %771 = vmatpush3.bf16.msra.mxu1 %v770_v7 }
 0x159   :  { %772 = vmatprep.subr.bf16.mxu1 %v950_v1 }
 0x15a   :  { %789 = vmatpush3.bf16.msra.mxu0 %v788_v41 }
 0x15b   :  { %790 = vmatprep.subr.bf16.mxu0 %v950_v1 }
 0x15c   :  { %774 = vmatpush3.bf16.msra.mxu1 %v773_v10 }
 0x15d   :  { %775 = vmatprep.subr.bf16.mxu1 %v950_v1 }
 0x15e   :  { %792 = vmatpush3.bf16.msra.mxu0 %v791_v44 }
 0x15f   :  { %793 = vmatprep.subr.bf16.mxu0 %v950_v1 }
 0x160   :  { %777 = vmatpush3.bf16.msra.mxu1 %v776_v13 }
 0x162   :  { %795 = vmatpush3.bf16.msra.mxu0 %v794_v47 }
 0x163   :  { %796 = vmatprep.subr.bf16.mxu0 %v950_v1 }
 0x166   :  { %798 = vmatpush3.bf16.msra.mxu0 %v797_v50 }
 0x167   :  { %799 = vmatprep.subr.bf16.mxu0 %v950_v1 }
 0x16a   :  { %801 = vmatpush3.bf16.msra.mxu0 %v800_v53 }
 0x220   :  { %v327_v16 = vpop.f32.mrb[0].mxu0 }
 0x221   :  { %v328_v17 = vadd.f32 %v327_v16, %v260_v15  ;;  %v656_v18 = vpop.f32.mrb[1].mxu0 }
 0x223   :  { %v331_v19 = vmin.f32 %v328_v17, 20.0 }
 0x225   :  { %v332_v20 = vmul.f32 1.442695, %v331_v19 }
 0x227   :  { %816 = vpow2.f32 %v332_v20 }
 0x231   :  { %v817_v21 = vpop.eup %816 }
 0x232   :  { %v334_v22 = vadd.f32 2.0, %v817_v21 }
 0x234   :  { %v335_v23 = vmul.f32 %v817_v21, %v334_v22 }
 0x236   :  { %v337_v24 = vadd.f32 2.0, %v335_v23  ;;  %v336_v25 = vmul.f32 %v335_v23, %v328_v17 }
 0x238   :  { %818 = vrcp.f32 %v337_v24 }
 0x242   :  { %v819_v26 = vpop.eup %818 }
 0x243   :  { %v339_v27 = vmul.f32 %v819_v26, %v336_v25 }
 0x245   :  { %690 = vmatmul.mubr.f32.vlgmr.msra.gmra.mrb[4].mxu1 %v339_v27 }
 0x318   :  { %v427_v56 = vpop.f32.mrb[4].mxu1 }
 0x319   :  { %v428_v57 = vadd.f32 %v427_v56, %v360_v55  ;;  %v691_v58 = vpop.f32.mrb[5].mxu1 }
 0x31b   :  { %v431_v59 = vmin.f32 %v428_v57, 20.0 }
 0x31d   :  { %v432_v60 = vmul.f32 1.442695, %v431_v59 }
 0x31f   :  { %820 = vpow2.f32 %v432_v60 }
 0x329   :  { %v821_v61 = vpop.eup %820 }
 0x32a   :  { %v434_v62 = vadd.f32 2.0, %v821_v61 }
 0x32c   :  { %v435_v63 = vmul.f32 %v821_v61, %v434_v62 }
 0x32e   :  { %v437_v0 = vadd.f32 2.0, %v435_v63  ;;  %v436_v1 = vmul.f32 %v435_v63, %v428_v57 }
 0x330   :  { %822 = vrcp.f32 %v437_v0 }
 0x33a   :  { %v823_v2 = vpop.eup %822 }
 0x33b   :  { %v439_v3 = vmul.f32 %v823_v2, %v436_v1 }
 0x33d   :  { %725 = vmatmul.mubr.f32.vlgmr.msra.gmra.mrb[2].mxu0 %v439_v3 }
 0x410   :  { %v527_v6 = vpop.f32.mrb[2].mxu0 }
 0x411   :  { %v528_v7 = vadd.f32 %v527_v6, %v460_v5  ;;  %v726_v8 = vpop.f32.mrb[3].mxu0 }
 0x413   :  { %531 = vst [vmem:[#allocation10] sm:$0xff] %v528_v7 }
 0x414   :  { %923 = shalt.err (!%p920_p8)
}
 0x415   :  { %s924_s19 = scalar_lea.hbm %s1099_s5, 128 }
 0x416   :  { %p925_p9 = scmp.ne.s32.totalorder %s1099_s5, %s924_s19  ;;  %p928_p10 = scmp.lt.u32.totalorder %s924_s19, %s1099_s5 }
 0x418   :  { %p930_p11 = pnand %p928_p10, %p925_p9 }
 0x41a   :  { %933 = shalt.err (!%p930_p11)
}
 0x41b   :  { %541 = dma.vmem_to_hbm [thread:$0]  %s539_s15, 128, %s1099_s5, [#allocation4]  }
 0x41c   :  { %940 = dma.done.wait [#allocation4], 128  }
 0x41d   :  { %941 = vsyncadd [#allocation4], 4294967168 }
 0x41e   :  { %545 = vsyncpa [#allocation3], 1 }
 0x41f   :  { %546 = vsyncpa [#allocation6], 1 }
 0x420   :  { %547 = vsyncpa [#allocation9], 1 }
 0x421   :  { %548 = vsyncpa [#allocation4], 1 }

</bundles_post_ra>
